<compile_context>
chip_gen: v7x
topology: tpu7x:2x2x1
jax: 0.10.0
libtpu: 0.0.40
codegen_flags: <defaults>
</compile_context>

<pallas_src>
import jax
import jax.numpy as jnp
from jax.experimental import pallas as pl
from jax.experimental.pallas import tpu as pltpu

LANES = 128
SUBLANES = 8
BLOCK_ROWS_MAX = 2048   # (2048, 128) f32 = 1 MiB per input block
N_CORES_MAX = 2         # leading "parallel" grid axis (v7x megacore; no-op on 1-TC chips)


def dice_loss(logits, targets, softmax=False):
    """JAX/Pallas equivalent of the PyTorch DiceLoss.forward."""
    smooth = 1e-07
    n = logits.size

    if softmax:
        # Softmax needs the channel axis, so it is applied in the wrapper;
        # the kernel then only does the (mem-bound) reduction.
        x = jax.nn.softmax(logits.astype(jnp.float32), axis=1).reshape(-1)
        apply_sigmoid = False
    else:
        x = logits.reshape(-1)          # native dtype, cast in-kernel
        apply_sigmoid = True
    t = targets.reshape(-1)             # native dtype, cast in-kernel

    # Main region: multiple of 8*128 elements so (R, 128) rows are a multiple of 8.
    chunk = SUBLANES * LANES
    n_main = (n // chunk) * chunk

    # Tail (< 1024 elements) reduced in plain JAX -- avoids any full-array pad copy.
    if n_main < n:
        xt = x[n_main:].astype(jnp.float32)
        tt = t[n_main:].astype(jnp.float32)
        pt = jax.nn.sigmoid(xt) if apply_sigmoid else xt
        tail_inter = jnp.sum(pt * tt)
        tail_p = jnp.sum(pt)
        tail_t = jnp.sum(tt)
    else:
        tail_inter = jnp.float32(0.0)
        tail_p = jnp.float32(0.0)
        tail_t = jnp.float32(0.0)

    if n_main == 0:
        inter, p_sum, t_sum = tail_inter, tail_p, tail_t
    else:
        R = n_main // LANES                                  # multiple of 8
        x_main = x if n_main == n else x[:n_main]
        t_main = t if n_main == n else t[:n_main]
        x2 = x_main.reshape(R, LANES)
        t2 = t_main.reshape(R, LANES)

        block_rows = min(BLOCK_ROWS_MAX, R)                  # multiple of 8, <= R
        nb = pl.cdiv(R, block_rows)                          # row-blocks total
        cores = min(N_CORES_MAX, nb)                         # don't over-split tiny inputs
        spc = pl.cdiv(nb, cores)                             # row-blocks per core
        # Masking only needed if the grid over-covers the array (partial last
        # block or odd number of blocks split across the cores).
        mask_needed = (cores * spc * block_rows) != R

        def kernel(x_ref, t_ref, o_ref):
            c = pl.program_id(0)
            i = pl.program_id(1)

            @pl.when(i == 0)
            def _():
                o_ref[...] = jnp.zeros_like(o_ref)

            xv = x_ref[...].astype(jnp.float32)
            tv = t_ref[...].astype(jnp.float32)
            pv = jax.nn.sigmoid(xv) if apply_sigmoid else xv

            if mask_needed:
                # Global row index of this (intended) block vs. valid row count.
                g = c * spc + i
                row0 = g * block_rows
                rows = jax.lax.broadcasted_iota(
                    jnp.int32, (block_rows, LANES), 0)
                valid = (rows + row0) < R
                pv = jnp.where(valid, pv, 0.0)
                tv = jnp.where(valid, tv, 0.0)

            # Pure-VPU elementwise accumulation into vreg-shaped (8,128) slots.
            o_ref[0] += (pv * tv).reshape(-1, SUBLANES, LANES).sum(axis=0)
            o_ref[1] += pv.reshape(-1, SUBLANES, LANES).sum(axis=0)
            o_ref[2] += tv.reshape(-1, SUBLANES, LANES).sum(axis=0)

        def in_map(c, i):
            # Clamp so a (possibly) over-covering last step never indexes OOB;
            # its contribution is zeroed by the in-kernel mask.
            return (jnp.minimum(c * spc + i, nb - 1), 0)

        in_spec = pl.BlockSpec((block_rows, LANES), in_map)
        out_spec = pl.BlockSpec((None, 3, SUBLANES, LANES),
                                lambda c, i: (c, 0, 0, 0))

        partial = pl.pallas_call(
            kernel,
            out_shape=jax.ShapeDtypeStruct((cores, 3, SUBLANES, LANES),
                                           jnp.float32),
            grid_spec=pltpu.PrefetchScalarGridSpec(
                num_scalar_prefetch=0,
                grid=(cores, spc),
                in_specs=[in_spec, in_spec],
                out_specs=out_spec,
            ),
            compiler_params=pltpu.CompilerParams(
                dimension_semantics=("parallel", "arbitrary"),
                vmem_limit_bytes=32 * 1024 * 1024,
            ),
        )(x2, t2)

        sums = jnp.sum(partial, axis=(0, 2, 3))              # (3,)
        inter = sums[0] + tail_inter
        p_sum = sums[1] + tail_p
        t_sum = sums[2] + tail_t

    dice_score = (2.0 * inter + smooth) / (p_sum + t_sum + smooth)
    return 1.0 - dice_score


def _reference(logits, targets, softmax=False):
    x = logits.astype(jnp.float32)
    t = targets.astype(jnp.float32).reshape(-1)
    if softmax:
        p = jax.nn.softmax(x, axis=1).reshape(-1)
    else:
        p = jax.nn.sigmoid(x).reshape(-1)
    smooth = 1e-07
    d = (2.0 * jnp.sum(p * t) + smooth) / (jnp.sum(p) + jnp.sum(t) + smooth)
    return 1.0 - d


if __name__ == "__main__":
    key = jax.random.PRNGKey(0)
    k1, k2 = jax.random.split(key)

    # NCHW logits, binary targets (same shape), matching the PyTorch module usage.
    logits = jax.random.normal(k1, (2, 4, 16, 16), dtype=jnp.float32)
    targets = (jax.random.uniform(k2, (2, 4, 16, 16)) > 0.5).astype(jnp.float32)

    # Default path: softmax=False (sigmoid), as in the PyTorch module default.
    loss = dice_loss(logits, targets)
    loss = jax.block_until_ready(loss)
    ref = _reference(logits, targets)
    assert jnp.allclose(loss, ref, atol=1e-5, rtol=1e-5), (loss, ref)

    # Optional softmax path.
    loss_s = jax.block_until_ready(dice_loss(logits, targets, softmax=True))
    ref_s = _reference(logits, targets, softmax=True)
    assert jnp.allclose(loss_s, ref_s, atol=1e-5, rtol=1e-5), (loss_s, ref_s)

    print("KERNEL_OK")
</pallas_src>

<mosaic_0001>
module attributes {stable_mosaic.version = 11 : i64} {
  func.func @kernel(%arg0: i32, %arg1: i32, %arg2: memref<16x128xf32, #tpu.memory_space<vmem>>, %arg3: memref<16x128xf32, #tpu.memory_space<vmem>>, %arg4: memref<1x3x8x128xf32, #tpu.memory_space<vmem>>) attributes {dimension_semantics = [#tpu.dimension_semantics<parallel>, #tpu.dimension_semantics<arbitrary>], iteration_bounds = array<i64: 1, 1>, scalar_prefetch = 0 : i64, scratch_operands = 0 : i64, tpu.core_type = #tpu.core_type<tc>, window_params = [{transform_indices = @transform_0, window_bounds = array<i64: 16, 128>}, {transform_indices = @transform_1, window_bounds = array<i64: 16, 128>}, {transform_indices = @transform_2, window_bounds = array<i64: 1, 3, 8, 128>}]} {
    %c0_i32 = arith.constant 0 : i32
    %0 = arith.cmpi eq, %arg1, %c0_i32 : i32
    %1 = arith.extui %0 : i1 to i32
    %c0_i32_0 = arith.constant 0 : i32
    %2 = arith.cmpi ne, %1, %c0_i32_0 : i32
    scf.if %2 {
      %cst_29 = arith.constant 0.000000e+00 : f32
      %35 = vector.broadcast %cst_29 : f32 to vector<3x8x128xf32>
      %c0_30 = arith.constant 0 : index
      %c0_31 = arith.constant 0 : index
      %c0_32 = arith.constant 0 : index
      %c0_33 = arith.constant 0 : index
      %36 = vector.load %arg4[%c0_30, %c0_31, %c0_32, %c0_33] : memref<1x3x8x128xf32, #tpu.memory_space<vmem>>, vector<1x3x8x128xf32>
      %37 = vector.shape_cast %36 : vector<1x3x8x128xf32> to vector<3x8x128xf32>
      %38 = vector.shape_cast %35 : vector<3x8x128xf32> to vector<1x3x8x128xf32>
      tpu.vector_store %arg4[%c0_30, %c0_31, %c0_32, %c0_33], %38 {strides = array<i32>} : memref<1x3x8x128xf32, #tpu.memory_space<vmem>>, vector<1x3x8x128xf32>,
    } else {
    }
    %c0 = arith.constant 0 : index
    %c0_1 = arith.constant 0 : index
    %3 = vector.load %arg2[%c0, %c0_1] : memref<16x128xf32, #tpu.memory_space<vmem>>, vector<16x128xf32>
    %c0_2 = arith.constant 0 : index
    %c0_3 = arith.constant 0 : index
    %4 = vector.load %arg3[%c0_2, %c0_3] : memref<16x128xf32, #tpu.memory_space<vmem>>, vector<16x128xf32>
    %5 = arith.negf %3 : vector<16x128xf32>
    %6 = math.exp %5 : vector<16x128xf32>
    %cst = arith.constant 1.000000e+00 : f32
    %7 = vector.broadcast %cst : f32 to vector<16x128xf32>
    %8 = arith.addf %7, %6 : vector<16x128xf32>
    %9 = arith.divf %7, %8 : vector<16x128xf32>
    %c0_4 = arith.constant 0 : index
    %c0_5 = arith.constant 0 : index
    %c0_6 = arith.constant 0 : index
    %c0_7 = arith.constant 0 : index
    %10 = vector.load %arg4[%c0_4, %c0_5, %c0_6, %c0_7] : memref<1x3x8x128xf32, #tpu.memory_space<vmem>>, vector<1x1x8x128xf32>
    %11 = vector.shape_cast %10 : vector<1x1x8x128xf32> to vector<8x128xf32>
    %12 = arith.mulf %9, %4 : vector<16x128xf32>
    %13 = vector.shape_cast %12 : vector<16x128xf32> to vector<2x8x128xf32>
    %cst_8 = arith.constant dense<0.000000e+00> : vector<8x128xf32>
    %14 = vector.multi_reduction <add>, %13, %cst_8 [0] : vector<2x8x128xf32> to vector<8x128xf32>
    %15 = arith.addf %11, %14 : vector<8x128xf32>
    %c0_9 = arith.constant 0 : index
    %c0_10 = arith.constant 0 : index
    %c0_11 = arith.constant 0 : index
    %c0_12 = arith.constant 0 : index
    %16 = vector.load %arg4[%c0_9, %c0_10, %c0_11, %c0_12] : memref<1x3x8x128xf32, #tpu.memory_space<vmem>>, vector<1x1x8x128xf32>
    %17 = vector.shape_cast %16 : vector<1x1x8x128xf32> to vector<8x128xf32>
    %18 = vector.shape_cast %15 : vector<8x128xf32> to vector<1x1x8x128xf32>
    tpu.vector_store %arg4[%c0_9, %c0_10, %c0_11, %c0_12], %18 {strides = array<i32>} : memref<1x3x8x128xf32, #tpu.memory_space<vmem>>, vector<1x1x8x128xf32>,
    %c0_13 = arith.constant 0 : index
    %c1 = arith.constant 1 : index
    %c0_14 = arith.constant 0 : index
    %c0_15 = arith.constant 0 : index
    %19 = vector.load %arg4[%c0_13, %c1, %c0_14, %c0_15] : memref<1x3x8x128xf32, #tpu.memory_space<vmem>>, vector<1x1x8x128xf32>
    %20 = vector.shape_cast %19 : vector<1x1x8x128xf32> to vector<8x128xf32>
    %21 = vector.shape_cast %9 : vector<16x128xf32> to vector<2x8x128xf32>
    %cst_16 = arith.constant dense<0.000000e+00> : vector<8x128xf32>
    %22 = vector.multi_reduction <add>, %21, %cst_16 [0] : vector<2x8x128xf32> to vector<8x128xf32>
    %23 = arith.addf %20, %22 : vector<8x128xf32>
    %c0_17 = arith.constant 0 : index
    %c1_18 = arith.constant 1 : index
    %c0_19 = arith.constant 0 : index
    %c0_20 = arith.constant 0 : index
    %24 = vector.load %arg4[%c0_17, %c1_18, %c0_19, %c0_20] : memref<1x3x8x128xf32, #tpu.memory_space<vmem>>, vector<1x1x8x128xf32>
    %25 = vector.shape_cast %24 : vector<1x1x8x128xf32> to vector<8x128xf32>
    %26 = vector.shape_cast %23 : vector<8x128xf32> to vector<1x1x8x128xf32>
    tpu.vector_store %arg4[%c0_17, %c1_18, %c0_19, %c0_20], %26 {strides = array<i32>} : memref<1x3x8x128xf32, #tpu.memory_space<vmem>>, vector<1x1x8x128xf32>,
    %c0_21 = arith.constant 0 : index
    %c2 = arith.constant 2 : index
    %c0_22 = arith.constant 0 : index
    %c0_23 = arith.constant 0 : index
    %27 = vector.load %arg4[%c0_21, %c2, %c0_22, %c0_23] : memref<1x3x8x128xf32, #tpu.memory_space<vmem>>, vector<1x1x8x128xf32>
    %28 = vector.shape_cast %27 : vector<1x1x8x128xf32> to vector<8x128xf32>
    %29 = vector.shape_cast %4 : vector<16x128xf32> to vector<2x8x128xf32>
    %cst_24 = arith.constant dense<0.000000e+00> : vector<8x128xf32>
    %30 = vector.multi_reduction <add>, %29, %cst_24 [0] : vector<2x8x128xf32> to vector<8x128xf32>
    %31 = arith.addf %28, %30 : vector<8x128xf32>
    %c0_25 = arith.constant 0 : index
    %c2_26 = arith.constant 2 : index
    %c0_27 = arith.constant 0 : index
    %c0_28 = arith.constant 0 : index
    %32 = vector.load %arg4[%c0_25, %c2_26, %c0_27, %c0_28] : memref<1x3x8x128xf32, #tpu.memory_space<vmem>>, vector<1x1x8x128xf32>
    %33 = vector.shape_cast %32 : vector<1x1x8x128xf32> to vector<8x128xf32>
    %34 = vector.shape_cast %31 : vector<8x128xf32> to vector<1x1x8x128xf32>
    tpu.vector_store %arg4[%c0_25, %c2_26, %c0_27, %c0_28], %34 {strides = array<i32>} : memref<1x3x8x128xf32, #tpu.memory_space<vmem>>, vector<1x1x8x128xf32>,
    return
  }
  func.func @transform_0(%arg0: i32, %arg1: i32) -> (i32, i32) {
    %c1_i32 = arith.constant 1 : i32
    %0 = arith.muli %arg0, %c1_i32 : i32
    %1 = arith.addi %0, %arg1 : i32
    %c0_i32 = arith.constant 0 : i32
    %2 = arith.minsi %1, %c0_i32 : i32
    %c0_i32_0 = arith.constant 0 : i32
    %c0_i32_1 = arith.constant 0 : i32
    return %2, %c0_i32_0 : i32, i32
  }
  func.func @transform_1(%arg0: i32, %arg1: i32) -> (i32, i32) {
    %c1_i32 = arith.constant 1 : i32
    %0 = arith.muli %arg0, %c1_i32 : i32
    %1 = arith.addi %0, %arg1 : i32
    %c0_i32 = arith.constant 0 : i32
    %2 = arith.minsi %1, %c0_i32 : i32
    %c0_i32_0 = arith.constant 0 : i32
    %c0_i32_1 = arith.constant 0 : i32
    return %2, %c0_i32_0 : i32, i32
  }
  func.func @transform_2(%arg0: i32, %arg1: i32) -> (i32, i32, i32, i32) {
    %c0_i32 = arith.constant 0 : i32
    %c0_i32_0 = arith.constant 0 : i32
    %c0_i32_1 = arith.constant 0 : i32
    %c0_i32_2 = arith.constant 0 : i32
    return %arg0, %c0_i32, %c0_i32_0, %c0_i32_1 : i32, i32, i32, i32
  }
}

</mosaic_0001>

<bundles_post_ra>
// kernel: tpu_custom_call.1
= control target key start
LH: loop header
LB: loop body
LE: loop exit
PB: predicated region body
PF: predicated region fallthrough
CT: control target
= control target key end

     0   :  { %7 = vsyncpa [#allocation3], 0  ;;  %s274_s0 = inlined_call_operand.hbm [shape: f32[16,128], index: 0, kind: input, shape index: {}]   ;;  %s275_s1 = inlined_call_operand.hbm [shape: f32[16,128], index: 1, kind: input, shape index: {}]   ;;  %s276_s2 = inlined_call_operand.hbm [shape: f32[1,3,8,128], index: 2, kind: output, shape index: {}]  }
   0x1   :  { %8 = vsyncpa [#allocation6], 0 }
   0x2   :  { %9 = vsyncpa [#allocation4], 0  ;;  %s209_s9 = smov [#allocation2]   ;;  %s137_s13 = scalar_lea.hbm %s274_s0, 256 }
   0x3   :  { %s21_s10 = sshll.u32 %s209_s9, 4  ;;  %p138_p0 = scmp.ne.s32.totalorder %s274_s0, %s137_s13  ;;  %s22_s10 = int_to_ptr.vmem [resolvable:$true] %s21_s10 }
   0x4   :  { %p141_p1 = scmp.lt.u32.totalorder %s137_s13, %s274_s0 }
   0x6   :  { %p143_p2 = pnand %p141_p1, %p138_p0 }
   0x8   :  { %146 = shalt.err (!%p143_p2)
}
   0x9   :  { %s147_s18 = scalar_lea.vmem %s22_s10, 256  ;;  %p152_p4 = scmp.lt.s32.totalorder %s22_s10, %s22_s10 }
   0xa   :  { %p148_p3 = scmp.ne.s32.totalorder %s22_s10, %s147_s18  ;;  %p153_p5 = scmp.lt.s32.totalorder %s147_s18, %s147_s18 }
   0xc   :  { %p154_p6 = por %p153_p5, %p152_p4 }
   0xe   :  { %p155_p7 = pnand %p154_p6, %p148_p3 }
  0x10   :  { %158 = shalt.err (!%p155_p7)
}
  0x11   :  { %s210_s19 = smov 128   ;;  %s211_s20 = smov 8  }
  0x12   :  { %27 = dma.hbm_to_vmem [thread:$0]  %s274_s0, 256, %s22_s10, [#allocation3], %s210_s19, %s210_s19, %s211_s20  }
  0x13   :  { %s212_s23 = smov [#allocation5]   ;;  %s159_s27 = scalar_lea.hbm %s275_s1, 256 }
  0x14   :  { %s39_s24 = sshll.u32 %s212_s23, 4  ;;  %p160_p8 = scmp.ne.s32.totalorder %s275_s1, %s159_s27  ;;  %s40_s24 = int_to_ptr.vmem [resolvable:$true] %s39_s24 }
  0x15   :  { %p163_p9 = scmp.lt.u32.totalorder %s159_s27, %s275_s1 }
  0x17   :  { %p165_p10 = pnand %p163_p9, %p160_p8 }
  0x19   :  { %168 = shalt.err (!%p165_p10)
}
  0x1a   :  { %s169_s4 = scalar_lea.vmem %s40_s24, 256  ;;  %p174_p12 = scmp.lt.s32.totalorder %s40_s24, %s40_s24 }
  0x1b   :  { %p170_p11 = scmp.ne.s32.totalorder %s40_s24, %s169_s4  ;;  %p175_p13 = scmp.lt.s32.totalorder %s169_s4, %s169_s4 }
  0x1d   :  { %p176_p0 = por %p175_p13, %p174_p12 }
  0x1f   :  { %p177_p1 = pnand %p176_p0, %p170_p11 }
  0x21   :  { %180 = shalt.err (!%p177_p1)
}
  0x22   :  { %45 = dma.hbm_to_vmem [thread:$0]  %s275_s1, 256, %s40_s24, [#allocation6], %s210_s19, %s210_s19, %s211_s20  }
  0x23   :  { %203 = dma.done.wait [#allocation3], 256  }
  0x24   :  { %204 = vsyncadd [#allocation3], 4294967040 }
  0x25   :  { %205 = dma.done.wait [#allocation6], 256  }
  0x26   :  { %206 = vsyncadd [#allocation6], 4294967040  ;;  %v67_v0 = vld [vmem:[#allocation2] sm:$0xff]  ;;  %v68_v1 = vld [vmem:[#allocation2 + $0x8] sm:$0xff]  ;;  %s213_s1 = smov [#allocation7]  }
  0x27   :  { %v69_v2 = vld [vmem:[#allocation5] sm:$0xff]  ;;  %v70_v3 = vld [vmem:[#allocation5 + $0x8] sm:$0xff]  ;;  %v121_v4 = vmul.f32 -1.442695, %v67_v0  ;;  %v122_v5 = vmul.f32 -1.442695, %v68_v1 }
  0x28   :  { %v96_v6 = vadd.f32 %v70_v3, %v69_v2  ;;  %s104_s6 = sshll.u32 %s213_s1, 4  ;;  %s105_s6 = int_to_ptr.vmem [resolvable:$true] %s104_s6 }
  0x29   :  { %129 = vpow2.f32 %v121_v4  ;;  %s181_s7 = scalar_lea.vmem %s105_s6, 384  ;;  %p186_p3 = scmp.lt.s32.totalorder %s105_s6, %s105_s6 }
  0x2a   :  { %131 = vpow2.f32 %v122_v5  ;;  %98 = vst [vmem:[#allocation7 + $0x10] sm:$0xff] %v96_v6  ;;  %p182_p2 = scmp.ne.s32.totalorder %s105_s6, %s181_s7  ;;  %p187_p4 = scmp.lt.s32.totalorder %s181_s7, %s181_s7 }
  0x2c   :  { %p188_p5 = por %p187_p4, %p186_p3 }
  0x2e   :  { %p189_p6 = pnand %p188_p5, %p182_p2 }
  0x33   :  { %v130_v7 = vpop.eup %129 }
  0x34   :  { %v132_v8 = vpop.eup %131  ;;  %v77_v9 = vadd.f32 1.0, %v130_v7 }
  0x35   :  { %v78_v10 = vadd.f32 1.0, %v132_v8 }
  0x36   :  { %133 = vrcp.f32 %v77_v9 }
  0x37   :  { %135 = vrcp.f32 %v78_v10 }
  0x40   :  { %v134_v11 = vpop.eup %133 }
  0x41   :  { %v136_v12 = vpop.eup %135  ;;  %v84_v13 = vmul.f32 %v134_v11, %v69_v2 }
  0x42   :  { %v85_v14 = vmul.f32 %v136_v12, %v70_v3  ;;  %v91_v15 = vadd.f32 %v136_v12, %v134_v11 }
  0x44   :  { %v86_v16 = vadd.f32 %v85_v14, %v84_v13  ;;  %93 = vst [vmem:[#allocation7 + $0x8] sm:$0xff] %v91_v15 }
  0x46   :  { %88 = vst [vmem:[#allocation7] sm:$0xff] %v86_v16 }
  0x47   :  { %192 = shalt.err (!%p189_p6)
}
  0x48   :  { %s193_s10 = scalar_lea.hbm %s276_s2, 384 }
  0x49   :  { %p194_p7 = scmp.ne.s32.totalorder %s276_s2, %s193_s10  ;;  %p197_p8 = scmp.lt.u32.totalorder %s193_s10, %s276_s2 }
  0x4b   :  { %p199_p9 = pnand %p197_p8, %p194_p7 }
  0x4d   :  { %202 = shalt.err (!%p199_p9)
}
  0x4e   :  { %110 = dma.vmem_to_hbm [thread:$0]  %s105_s6, 384, %s276_s2, [#allocation4], %s210_s19, %s210_s19, %s211_s20  }
  0x4f   :  { %207 = dma.done.wait [#allocation4], 384  }
  0x50   :  { %208 = vsyncadd [#allocation4], 4294966912 }
  0x51   :  { %114 = vsyncpa [#allocation3], 1 }
  0x52   :  { %115 = vsyncpa [#allocation6], 1 }
  0x53   :  { %116 = vsyncpa [#allocation4], 1 }

</bundles_post_ra>
